<compile_context>
chip_gen: v6e
topology: v6e:2x2x1
jax: 0.10.0
libtpu: 0.0.40
codegen_flags: <defaults>
</compile_context>

<pallas_src>
import jax
import jax.numpy as jnp
from jax import lax
from jax.experimental import pallas as pl
from jax.experimental.pallas import tpu as pltpu

_NEG_BIG = -1e30                        # "minus infinity" that never makes inf/NaN
_BLOCK_TARGET_BYTES = 8 * 1024 * 1024   # ~8 MiB of logits per grid step
_VMEM_LIMIT_BYTES = 40 * 1024 * 1024    # safe on v5e/v6e (128 MiB) and v7x (64 MiB)


def _round_up(x, m):
    return ((x + m - 1) // m) * m


def _pick_tiles(C, N, itemsize):
    """Byte-targeted, generation-safe tile sizes for a (C, N) logits array."""
    # --- sample (lane) tile: multiple of 128, or the full dim when N < 128 ---
    if N < 128:
        n_tile = N                               # block dim == full array dim (legal)
    else:
        n_tile = min(512, (N // 128) * 128)
        if pl.cdiv(N, n_tile) < 2:               # >=2 i-tiles so 'parallel' axis can
            n_tile = max(128, _round_up(pl.cdiv(N, 2), 128))  # span both v7x cores
    # --- class (sublane) tile: multiple of 8, sized so the block is ~8 MiB ---
    if C < 8:
        c_tile = C                               # block dim == full array dim (legal)
    else:
        c_fit = max(8, (_BLOCK_TARGET_BYTES // (n_tile * itemsize)) // 8 * 8)
        c_tile = int(min(c_fit, _round_up(C, 8)))
    return c_tile, n_tile


def _make_lse_kernel(c_valid_last, needs_mask):
    """Online logsumexp over the class (sublane) axis of (c_tile, n_tile) blocks."""

    def kernel(logits_ref, out_ref, m_acc, s_acc):
        k = pl.program_id(1)
        num_k = pl.num_programs(1)

        @pl.when(k == 0)
        def _init():
            m_acc[...] = jnp.full_like(m_acc, _NEG_BIG)
            s_acc[...] = jnp.zeros_like(s_acc)

        x = logits_ref[...].astype(jnp.float32)              # (c_tile, n_tile)

        def update(xt):
            tile_max = jnp.max(xt, axis=0, keepdims=True)    # (1, n_tile)
            m_prev = m_acc[...]
            m_new = jnp.maximum(m_prev, tile_max)
            s_acc[...] = s_acc[...] * jnp.exp(m_prev - m_new) + jnp.sum(
                jnp.exp(xt - m_new), axis=0, keepdims=True)
            m_acc[...] = m_new

        if needs_mask:
            # Fast unmasked path for all interior class tiles.
            @pl.when(k < num_k - 1)
            def _interior():
                update(x)

            # Ragged last class tile: force OOB class rows to -inf before
            # max/exp so stale VMEM garbage can't leak into valid lanes.
            @pl.when(k == num_k - 1)
            def _ragged_last():
                row = lax.broadcasted_iota(jnp.int32, x.shape, 0)
                update(jnp.where(row < c_valid_last, x, _NEG_BIG))
        else:
            update(x)

        @pl.when(k == num_k - 1)
        def _finalize():
            lse = m_acc[...] + jnp.log(s_acc[...])           # (1, n_tile)
            out_ref[...] = lse.reshape(out_ref.shape)

    return kernel


def crossentropy_forward(y_pred, y_true):
    """y_pred: (C, N) logits; y_true: (N,) integer labels. Returns scalar mean NLL."""
    C, N = y_pred.shape
    itemsize = jnp.dtype(y_pred.dtype).itemsize
    c_tile, n_tile = _pick_tiles(C, N, itemsize)

    grid_n = pl.cdiv(N, n_tile)
    grid_c = pl.cdiv(C, c_tile)
    c_valid_last = C - (grid_c - 1) * c_tile
    needs_mask = c_valid_last != c_tile

    cost = pl.CostEstimate(
        flops=4 * C * N,
        transcendentals=C * N + N,
        bytes_accessed=int(C * N * itemsize + grid_n * n_tile * 4),
    )

    lse_tiles = pl.pallas_call(
        _make_lse_kernel(c_valid_last, needs_mask),
        out_shape=jax.ShapeDtypeStruct((grid_n, 1, n_tile), jnp.float32),
        grid=(grid_n, grid_c),
        in_specs=[pl.BlockSpec((c_tile, n_tile), lambda i, k: (k, i))],   # logits (C, N)
        out_specs=pl.BlockSpec((1, 1, n_tile), lambda i, k: (i, 0, 0)),   # lane-dense lse
        scratch_shapes=[pltpu.VMEM((1, n_tile), jnp.float32),             # running max
                        pltpu.VMEM((1, n_tile), jnp.float32)],            # running sum-exp
        compiler_params=pltpu.CompilerParams(
            dimension_semantics=("parallel", "arbitrary"),
            vmem_limit_bytes=_VMEM_LIMIT_BYTES),
        cost_estimate=cost,
    )(y_pred)

    lse = lse_tiles.reshape(-1)[:N]                           # per-sample logsumexp

    # O(N) gather of the label logits, kept out of the HBM-bound kernel.
    labels = y_true.astype(jnp.int32)
    picked = y_pred[labels, jnp.arange(N)].astype(jnp.float32)

    # TODO(synk): labels are assumed to lie in [0, C) (no ignore_index), exactly
    # like the reference module.
    return jnp.sum(lse - picked) / N


def _reference(y_pred, y_true):
    """Pure-JAX reference with the module's exact semantics."""
    logits = y_pred.T.astype(jnp.float32)
    m = jnp.max(logits, axis=1, keepdims=True)
    e = jnp.exp(logits - m)
    p = e / jnp.sum(e, axis=1, keepdims=True)
    n = y_true.shape[0]
    return jnp.sum(-jnp.log(p[jnp.arange(n), y_true])) / n


if __name__ == "__main__":
    key = jax.random.PRNGKey(0)
    k1, k2, k3, k4 = jax.random.split(key, 4)

    # --- small aligned case: C=32 classes, N=8 samples (module convention: (C, N)) ---
    C0, N0 = 32, 8
    y_pred0 = jax.random.normal(k1, (C0, N0), dtype=jnp.float32)
    y_true0 = jax.random.randint(k2, (N0,), 0, C0, dtype=jnp.int32)
    loss0 = crossentropy_forward(y_pred0, y_true0)
    jax.block_until_ready(loss0)
    ref0 = _reference(y_pred0, y_true0)
    assert jnp.allclose(loss0, ref0, rtol=1e-5, atol=1e-5), (loss0, ref0)

    # --- ragged case (exercises in-kernel masking + multi-tile N): C=37, N=200 ---
    C1, N1 = 37, 200
    y_pred1 = jax.random.normal(k3, (C1, N1), dtype=jnp.float32)
    y_true1 = jax.random.randint(k4, (N1,), 0, C1, dtype=jnp.int32)
    loss1 = crossentropy_forward(y_pred1, y_true1)
    jax.block_until_ready(loss1)
    ref1 = _reference(y_pred1, y_true1)
    assert jnp.allclose(loss1, ref1, rtol=1e-5, atol=1e-5), (loss1, ref1)

    print("KERNEL_OK")
</pallas_src>

<mosaic_0001>
module attributes {stable_mosaic.version = 11 : i64} {
  func.func @kernel(%arg0: i32, %arg1: i32, %arg2: memref<32x8xf32, #tpu.memory_space<vmem>>, %arg3: memref<1x1x8xf32, #tpu.memory_space<vmem>>, %arg4: memref<1x8xf32, #tpu.memory_space<vmem>>, %arg5: memref<1x8xf32, #tpu.memory_space<vmem>>) attributes {dimension_semantics = [#tpu.dimension_semantics<parallel>, #tpu.dimension_semantics<arbitrary>], iteration_bounds = array<i64: 1, 1>, scalar_prefetch = 0 : i64, scratch_operands = 2 : i64, tpu.core_type = #tpu.core_type<tc>, window_params = [{transform_indices = @transform_0, window_bounds = array<i64: 32, 8>}, {transform_indices = @transform_1, window_bounds = array<i64: 1, 1, 8>}]} {
    %c0_i32 = arith.constant 0 : i32
    %0 = arith.cmpi eq, %arg1, %c0_i32 : i32
    %1 = arith.extui %0 : i1 to i32
    %c0_i32_0 = arith.constant 0 : i32
    %2 = arith.cmpi ne, %1, %c0_i32_0 : i32
    scf.if %2 {
      %cst_13 = arith.constant -1.000000e+30 : f32
      %23 = vector.broadcast %cst_13 : f32 to vector<1x8xf32>
      %c0_14 = arith.constant 0 : index
      %c0_15 = arith.constant 0 : index
      %24 = vector.load %arg4[%c0_14, %c0_15] : memref<1x8xf32, #tpu.memory_space<vmem>>, vector<1x8xf32>
      tpu.vector_store %arg4[%c0_14, %c0_15], %23 {strides = array<i32>} : memref<1x8xf32, #tpu.memory_space<vmem>>, vector<1x8xf32>,
      %cst_16 = arith.constant 0.000000e+00 : f32
      %25 = vector.broadcast %cst_16 : f32 to vector<1x8xf32>
      %c0_17 = arith.constant 0 : index
      %c0_18 = arith.constant 0 : index
      %26 = vector.load %arg5[%c0_17, %c0_18] : memref<1x8xf32, #tpu.memory_space<vmem>>, vector<1x8xf32>
      tpu.vector_store %arg5[%c0_17, %c0_18], %25 {strides = array<i32>} : memref<1x8xf32, #tpu.memory_space<vmem>>, vector<1x8xf32>,
    } else {
    }
    %c0 = arith.constant 0 : index
    %c0_1 = arith.constant 0 : index
    %3 = vector.load %arg2[%c0, %c0_1] : memref<32x8xf32, #tpu.memory_space<vmem>>, vector<32x8xf32>
    %cst = arith.constant dense<0xFF800000> : vector<8xf32>
    %4 = vector.multi_reduction <maximumf>, %3, %cst [0] : vector<32x8xf32> to vector<8xf32>
    %5 = vector.shape_cast %4 : vector<8xf32> to vector<1x8xf32>
    %c0_2 = arith.constant 0 : index
    %c0_3 = arith.constant 0 : index
    %6 = vector.load %arg4[%c0_2, %c0_3] : memref<1x8xf32, #tpu.memory_space<vmem>>, vector<1x8xf32>
    %7 = arith.maximumf %6, %5 : vector<1x8xf32>
    %c0_4 = arith.constant 0 : index
    %c0_5 = arith.constant 0 : index
    %8 = vector.load %arg5[%c0_4, %c0_5] : memref<1x8xf32, #tpu.memory_space<vmem>>, vector<1x8xf32>
    %9 = arith.subf %6, %7 : vector<1x8xf32>
    %10 = math.exp %9 : vector<1x8xf32>
    %11 = arith.mulf %8, %10 : vector<1x8xf32>
    %12 = vector.broadcast %7 : vector<1x8xf32> to vector<32x8xf32>
    %13 = arith.subf %3, %12 : vector<32x8xf32>
    %14 = math.exp %13 : vector<32x8xf32>
    %cst_6 = arith.constant dense<0.000000e+00> : vector<8xf32>
    %15 = vector.multi_reduction <add>, %14, %cst_6 [0] : vector<32x8xf32> to vector<8xf32>
    %16 = vector.shape_cast %15 : vector<8xf32> to vector<1x8xf32>
    %17 = arith.addf %11, %16 : vector<1x8xf32>
    %c0_7 = arith.constant 0 : index
    %c0_8 = arith.constant 0 : index
    %18 = vector.load %arg5[%c0_7, %c0_8] : memref<1x8xf32, #tpu.memory_space<vmem>>, vector<1x8xf32>
    tpu.vector_store %arg5[%c0_7, %c0_8], %17 {strides = array<i32>} : memref<1x8xf32, #tpu.memory_space<vmem>>, vector<1x8xf32>,
    %c0_9 = arith.constant 0 : index
    %c0_10 = arith.constant 0 : index
    %19 = vector.load %arg4[%c0_9, %c0_10] : memref<1x8xf32, #tpu.memory_space<vmem>>, vector<1x8xf32>
    tpu.vector_store %arg4[%c0_9, %c0_10], %7 {strides = array<i32>} : memref<1x8xf32, #tpu.memory_space<vmem>>, vector<1x8xf32>,
    %c0_i32_11 = arith.constant 0 : i32
    %20 = arith.cmpi eq, %arg1, %c0_i32_11 : i32
    %21 = arith.extui %20 : i1 to i32
    %c0_i32_12 = arith.constant 0 : i32
    %22 = arith.cmpi ne, %21, %c0_i32_12 : i32
    scf.if %22 {
      %c0_13 = arith.constant 0 : index
      %c0_14 = arith.constant 0 : index
      %23 = vector.load %arg4[%c0_13, %c0_14] : memref<1x8xf32, #tpu.memory_space<vmem>>, vector<1x8xf32>
      %c0_15 = arith.constant 0 : index
      %c0_16 = arith.constant 0 : index
      %24 = vector.load %arg5[%c0_15, %c0_16] : memref<1x8xf32, #tpu.memory_space<vmem>>, vector<1x8xf32>
      %25 = math.log %24 : vector<1x8xf32>
      %26 = arith.addf %23, %25 : vector<1x8xf32>
      %27 = vector.shape_cast %26 : vector<1x8xf32> to vector<1x1x8xf32>
      %c0_17 = arith.constant 0 : index
      %c0_18 = arith.constant 0 : index
      %c0_19 = arith.constant 0 : index
      %28 = vector.load %arg3[%c0_17, %c0_18, %c0_19] : memref<1x1x8xf32, #tpu.memory_space<vmem>>, vector<1x1x8xf32>
      tpu.vector_store %arg3[%c0_17, %c0_18, %c0_19], %27 {strides = array<i32>} : memref<1x1x8xf32, #tpu.memory_space<vmem>>, vector<1x1x8xf32>,
    } else {
    }
    return
  }
  func.func @transform_0(%arg0: i32, %arg1: i32) -> (i32, i32) {
    %c0_i32 = arith.constant 0 : i32
    return %arg1, %arg0 : i32, i32
  }
  func.func @transform_1(%arg0: i32, %arg1: i32) -> (i32, i32, i32) {
    %c0_i32 = arith.constant 0 : i32
    %c0_i32_0 = arith.constant 0 : i32
    %c0_i32_1 = arith.constant 0 : i32
    return %arg0, %c0_i32, %c0_i32_0 : i32, i32, i32
  }
}

</mosaic_0001>

<bundles_post_ra>
// kernel: tpu_custom_call.1
= control target key start
LH: loop header
LB: loop body
LE: loop exit
PB: predicated region body
PF: predicated region fallthrough
CT: control target
= control target key end

     0   :  { %vm13_vm0 = vcmask 57344   ;;  %v136_v3 = vmov -1e+30   ;;  %vm20_vm1 = vcmask 64512   ;;  %s177_s0 = inlined_call_operand.vmem [shape: f32[32,8], index: 0, kind: input, shape index: {}]   ;;  %s178_s1 = inlined_call_operand.hbm [shape: f32[1,1,8], index: 1, kind: output, shape index: {}]  }
   0x1   :  { %v16_v0 = vld [vmem:[%s177_s0] sm:$0xff]  ;;  %v17_v1 = vld [vmem:[%s177_s0 + $0x8] sm:$0xff]  ;;  %v18_v2 = vld [vmem:[%s177_s0 + $0x10] sm:$0xff]  ;;  %14 = vst.msk [vmem:[#allocation2] sm:$0x1] %vm13_vm0, %v136_v3 }
   0x2   :  { %v19_v4 = vld [vmem:[%s177_s0 + $0x18] sm:$0xff] }
   0x3   :  { %6 = vsyncpa [#allocation5], 0  ;;  %v21_v5 = vsel %vm20_vm1, %v16_v0, -inf  ;;  %v22_v6 = vsel %vm20_vm1, %v17_v1, -inf  ;;  %v23_v7 = vsel %vm20_vm1, %v18_v2, -inf  ;;  %v24_v8 = vsel %vm20_vm1, %v19_v4, -inf }
   0x4   :  { %v137_v9 = vmov 0.0   ;;  %v25_v10 = vmax.f32 %v21_v5, %v22_v6  ;;  %v26_v11 = vmax.f32 %v23_v7, %v24_v8  ;;  %v42_v15 = vlaneseq  ;;  %s138_s0 = smov [#allocation4]  }
   0x5   :  { %15 = vst.msk [vmem:[#allocation3] sm:$0x1] %vm13_vm0, %v137_v9  ;;  %s91_s14 = sshll.u32 %s138_s0, 4  ;;  %s92_s14 = int_to_ptr.vmem [resolvable:$true] %s91_s14 }
   0x6   :  { %v27_v12 = vmax.f32 %v25_v10, %v26_v11  ;;  %v43_v18 = vshrl.u32 %v42_v15, 7  ;;  %s114_s15 = scalar_lea.vmem %s92_s14, 16  ;;  %s118_s16 = scalar_lea.vmem %s92_s14, 32 }
   0x7   :  { %p115_p0 = scmp.ne.s32.totalorder %s92_s14, %s114_s15  ;;  %p119_p1 = scmp.lt.s32.totalorder %s92_s14, %s92_s14 }
   0x8   :  { %v28_v13 = vrot.slane %v27_v12, 4  ;;  %v34_v20 = vld [vmem:[#allocation2] sm:$0x1]  ;;  %v44_v22 = vsub.s32 0, %v43_v18  ;;  %p120_p2 = scmp.lt.s32.totalorder %s118_s16, %s114_s15 }
   0xa   :  { %v29_v14 = vmax.f32 %v27_v12, %v28_v13  ;;  %p121_p3 = por %p120_p2, %p119_p1 }
   0xc   :  { %v30_v16 = vrot.slane %v29_v14, 2  ;;  %v36_v51 = vld [vmem:[#allocation3] sm:$0x1]  ;;  %p122_p4 = pnand %p121_p3, %p115_p0 }
   0xe   :  { %v31_v17 = vmax.f32 %v29_v14, %v30_v16 }
  0x10   :  { %v32_v19 = vrot.slane %v31_v17, 1 }
  0x12   :  { %v33_v21 = vmax.f32 %v31_v17, %v32_v19 }
  0x14   :  { %v35_v23 = vmax.f32 %v34_v20, %v33_v21 }
  0x16   :  { %v45_v24 = vrot.slane %v35_v23, %v44_v22  ;;  %75 = vst.msk [vmem:[#allocation2] sm:$0x1] %vm13_vm0, %v35_v23  ;;  %v37_v33 = vsub.f32 %v34_v20, %v35_v23 }
  0x18   :  { %v47_v25 = vsub.f32 %v16_v0, %v45_v24  ;;  %v48_v26 = vsub.f32 %v17_v1, %v45_v24  ;;  %v49_v27 = vsub.f32 %v18_v2, %v45_v24  ;;  %v50_v28 = vsub.f32 %v19_v4, %v45_v24 }
  0x19   :  { %v38_v34 = vmul.f32 1.442695, %v37_v33 }
  0x1a   :  { %v51_v29 = vmul.f32 1.442695, %v47_v25  ;;  %v53_v30 = vmul.f32 1.442695, %v48_v26  ;;  %v55_v31 = vmul.f32 1.442695, %v49_v27 }
  0x1b   :  { %v57_v32 = vmul.f32 1.442695, %v50_v28 }
  0x1c   :  { %102 = vpow2.f32 %v51_v29 }
  0x1d   :  { %104 = vpow2.f32 %v53_v30  ;;  %v79_v59 = vld [vmem:[#allocation2] sm:$0x1] }
  0x1e   :  { %106 = vpow2.f32 %v55_v31 }
  0x1f   :  { %108 = vpow2.f32 %v57_v32 }
  0x20   :  { %110 = vpow2.f32 %v38_v34 }
  0x29   :  { %v103_v35 = vpop.eup %102 }
  0x2a   :  { %v105_v36 = vpop.eup %104  ;;  %v59_v37 = vsel %vm20_vm1, %v103_v35, 0.0 }
  0x2b   :  { %v107_v38 = vpop.eup %106  ;;  %v60_v39 = vsel %vm20_vm1, %v105_v36, 0.0 }
  0x2c   :  { %v109_v40 = vpop.eup %108  ;;  %v61_v41 = vadd.f32 %v60_v39, %v59_v37  ;;  %v62_v42 = vsel %vm20_vm1, %v107_v38, 0.0 }
  0x2d   :  { %v64_v44 = vsel %vm20_vm1, %v109_v40, 0.0  ;;  %v111_v50 = vpop.eup %110 }
  0x2e   :  { %v63_v43 = vadd.f32 %v62_v42, %v61_v41  ;;  %v40_v53 = vmul.f32 %v111_v50, %v36_v51 }
  0x30   :  { %v65_v45 = vadd.f32 %v64_v44, %v63_v43 }
  0x32   :  { %v66_v46 = vrot.slane %v65_v45, 4 }
  0x34   :  { %v67_v47 = vadd.f32 %v66_v46, %v65_v45 }
  0x36   :  { %v68_v48 = vrot.slane %v67_v47, 2 }
  0x38   :  { %v69_v49 = vadd.f32 %v68_v48, %v67_v47 }
  0x3a   :  { %v70_v52 = vrot.slane %v69_v49, 1 }
  0x3c   :  { %v71_v54 = vadd.f32 %v70_v52, %v69_v49 }
  0x3e   :  { %v72_v55 = vadd.f32 %v71_v54, %v40_v53 }
  0x40   :  { %74 = vst.msk [vmem:[#allocation3] sm:$0x1] %vm13_vm0, %v72_v55 }
  0x47   :  { %v80_v56 = vld [vmem:[#allocation3] sm:$0x1] }
  0x48   :  { %112 = vlog2.f32 %v80_v56 }
  0x55   :  { %v113_v57 = vpop.eup %112 }
  0x56   :  { %v82_v58 = vmul.f32 0.6931472, %v113_v57 }
  0x58   :  { %v83_v60 = vadd.f32 %v82_v58, %v79_v59 }
  0x5a   :  { %84 = vst.msk [vmem:[#allocation4] sm:$0x1] %vm13_vm0, %v83_v60 }
  0x5b   :  { %125 = shalt.err (!%p122_p4)
}
  0x5c   :  { %94 = dma.vmem_to_hbm [thread:$0]  %s92_s14, 16, %s178_s1, [#allocation5]  }
  0x5d   :  { %134 = dma.done.wait [#allocation5], 16  }
  0x5e   :  { %135 = vsyncadd [#allocation5], 4294967280 }
  0x5f   :  { %98 = vsyncpa [#allocation5], 1 }

</bundles_post_ra>
